<compile_context>
chip_gen: v7x
topology: tpu7x:2x2x1
jax: 0.10.0
libtpu: 0.0.40
codegen_flags: <defaults>
</compile_context>

<pallas_src>
import functools

import jax
import jax.numpy as jnp
from jax import lax
from jax.experimental import pallas as pl
from jax.experimental.pallas import tpu as pltpu

_EPS = 1e-5
_INV_SQRT2 = 0.7071067811865476


def _gelu_exact(x):
    # nn.GELU() default = exact erf formulation (bit-matching PyTorch).
    return 0.5 * x * (1.0 + lax.erf(x * _INV_SQRT2))


def _batchnorm_folded(h, gamma, beta, n_rows):
    # One-pass training-mode BatchNorm1d folded into a single affine:
    #   mean = E[h], var = max(E[h^2] - mean^2, 0)         (clamp: no NaN)
    #   scale = gamma * rsqrt(var + eps), shift = beta - mean * scale
    inv_n = 1.0 / float(n_rows)
    s = jnp.sum(h, axis=0, keepdims=True)
    ss = jnp.sum(h * h, axis=0, keepdims=True)
    mean = s * inv_n
    var = jnp.maximum(ss * inv_n - mean * mean, 0.0)
    scale = gamma * lax.rsqrt(var + _EPS)
    shift = beta - mean * scale
    return h * scale + shift


# ---------------------------------------------------------------------------
# Kernels.  Grid = (j, k): j = output-feature tile ("parallel"),
#                          k = K-reduction tile ("arbitrary", innermost).
# The output block's index map is constant in k, so it stays resident in VMEM
# and is used directly as the matmul accumulator (no acc scratch).
# ---------------------------------------------------------------------------

def _stage1_kernel(x_ref, w_ref, p_ref, h_ref):
    # h = GELU(BN1(x @ W1))          (Linear bias absorbed by batch mean)
    k = pl.program_id(1)
    nk = pl.num_programs(1)
    tk = w_ref.shape[0]
    n = x_ref.shape[0]

    @pl.when(k == 0)
    def _():
        h_ref[...] = jnp.zeros_like(h_ref)

    start = pl.multiple_of(k * tk, tk)
    lhs = x_ref[:, pl.ds(start, tk)].astype(w_ref.dtype)   # bf16 cast if bf16 weights
    h_ref[...] += jnp.dot(lhs, w_ref[...], preferred_element_type=jnp.float32)

    @pl.when(k == nk - 1)
    def _():
        h_ref[...] = _gelu_exact(
            _batchnorm_folded(h_ref[...], p_ref[0:1, :], p_ref[1:2, :], n))


def _stage2_kernel(h_ref, x_ref, w_ref, p_ref, o_ref):
    # out = GELU(x + BN2(h @ W2))
    k = pl.program_id(1)
    nk = pl.num_programs(1)
    tk = w_ref.shape[0]
    n = h_ref.shape[0]

    @pl.when(k == 0)
    def _():
        o_ref[...] = jnp.zeros_like(o_ref)

    start = pl.multiple_of(k * tk, tk)
    lhs = h_ref[:, pl.ds(start, tk)].astype(w_ref.dtype)
    o_ref[...] += jnp.dot(lhs, w_ref[...], preferred_element_type=jnp.float32)

    @pl.when(k == nk - 1)
    def _():
        o_ref[...] = _gelu_exact(
            x_ref[...] + _batchnorm_folded(o_ref[...], p_ref[2:3, :], p_ref[3:4, :], n))


# ---------------------------------------------------------------------------
# Wrapper.
# ---------------------------------------------------------------------------

def _pick_tiles(N, Dp, wbytes):
    """Generation-aware K/N tile sizes and VMEM limit."""
    vmem_cap = 64 * 1024 * 1024          # conservative default = v7x physical VMEM
    try:
        info = pltpu.get_tpu_info()
        cap = int(getattr(info, "vmem_capacity_bytes", 0) or 0)
        if cap > 0:
            vmem_cap = cap               # 128 MiB on v5e/v6e, 64 MiB on v7x
    except Exception:
        pass
    budget = int(0.70 * vmem_cap)

    def need(tk, tn):
        return (2 * N * Dp * 4           # resident f32 LHS (worst case 2 buffers)
                + 2 * tk * tn * wbytes   # double-buffered weight tile
                + 2 * 8 * tn * 4         # BN-param tile
                + 4 * N * tn * 4         # output block (+ residual tile), 2 bufs each
                + (2 << 20))             # compiler-internal slack

    cands = [t for t in (512, 256, 128) if Dp % t == 0]
    pairs = sorted(((a, b) for a in cands for b in cands),
                   key=lambda p: (p[0] * p[1], p[0]), reverse=True)
    tk, tn = next(((a, b) for a, b in pairs if need(a, b) <= budget), (128, 128))
    vmem_limit = min(max(int(1.25 * need(tk, tn)), 32 * 1024 * 1024),
                     int(0.90 * vmem_cap))
    return tk, tn, vmem_limit


def pack_resblock_params(w1_t, g1, be1, w2_t, g2, be2, weight_dtype=jnp.bfloat16):
    """Pre-pack (ONCE, outside the hot path) the ResBlock parameters.

    w1_t / w2_t: (D, D) pre-transposed nn.Linear weights (weight.T, i.e. (in, out)).
    g*/be*: BatchNorm1d gamma/beta, shape (D,) or (1, D).
    Linear biases are intentionally NOT taken: a bias added immediately before
    training-mode BatchNorm is absorbed by the batch mean (provably no effect).
    Features are zero-padded to a multiple of 128 lanes; padded columns stay 0.
    """
    D = w1_t.shape[0]
    Dp = ((D + 127) // 128) * 128
    w1p = w1_t.astype(weight_dtype)
    w2p = w2_t.astype(weight_dtype)
    if Dp != D:
        w1p = jnp.zeros((Dp, Dp), weight_dtype).at[:D, :D].set(w1p)
        w2p = jnp.zeros((Dp, Dp), weight_dtype).at[:D, :D].set(w2p)
    params = jnp.zeros((8, Dp), jnp.float32)
    params = (params.at[0, :D].set(jnp.ravel(g1).astype(jnp.float32))
                    .at[1, :D].set(jnp.ravel(be1).astype(jnp.float32))
                    .at[2, :D].set(jnp.ravel(g2).astype(jnp.float32))
                    .at[3, :D].set(jnp.ravel(be2).astype(jnp.float32)))
    return w1p, w2p, params


@functools.partial(jax.jit, static_argnames=("single_buffer_resident",))
def _resblock_impl(x, w1p, w2p, params, *, single_buffer_resident=True):
    N, D = x.shape
    Dp = w1p.shape[0]
    x_p = x.astype(jnp.float32)
    if D != Dp:
        x_p = jnp.pad(x_p, ((0, 0), (0, Dp - D)))

    wbytes = jnp.dtype(w1p.dtype).itemsize
    tk, tn, vmem_limit = _pick_tiles(N, Dp, wbytes)
    nj, nk = Dp // tn, Dp // tk

    def resident_spec(shape):
        # Constant-index (fetched-once) operand: no point double-buffering it.
        if single_buffer_resident:
            return pl.BlockSpec(shape, lambda j, k: (0, 0),
                                pipeline_mode=pl.Buffered(1))
        return pl.BlockSpec(shape, lambda j, k: (0, 0))

    compiler_params = pltpu.CompilerParams(
        dimension_semantics=("parallel", "arbitrary"),
        vmem_limit_bytes=int(vmem_limit))

    cost1 = pl.CostEstimate(
        flops=int(2 * N * Dp * Dp + 12 * N * Dp),
        transcendentals=int(N * Dp),
        bytes_accessed=int(Dp * Dp * wbytes + 2 * N * Dp * 4 + 8 * Dp * 4))
    cost2 = pl.CostEstimate(
        flops=int(2 * N * Dp * Dp + 14 * N * Dp),
        transcendentals=int(N * Dp),
        bytes_accessed=int(Dp * Dp * wbytes + 3 * N * Dp * 4 + 8 * Dp * 4))

    # Stage 1: h = GELU(BN1(x @ W1))
    h = pl.pallas_call(
        _stage1_kernel,
        out_shape=jax.ShapeDtypeStruct((N, Dp), jnp.float32),
        grid=(nj, nk),
        in_specs=[resident_spec((N, Dp)),                        # x (resident LHS)
                  pl.BlockSpec((tk, tn), lambda j, k: (k, j)),   # W1 K/N tile
                  pl.BlockSpec((8, tn), lambda j, k: (0, j))],   # packed BN params
        out_specs=pl.BlockSpec((N, tn), lambda j, k: (0, j)),
        compiler_params=compiler_params,
        cost_estimate=cost1,
    )(x_p, w1p, params)

    # Stage 2: out = GELU(x + BN2(h @ W2))
    y = pl.pallas_call(
        _stage2_kernel,
        out_shape=jax.ShapeDtypeStruct((N, Dp), jnp.float32),
        grid=(nj, nk),
        in_specs=[resident_spec((N, Dp)),                        # h (resident LHS)
                  pl.BlockSpec((N, tn), lambda j, k: (0, j)),    # x residual tile
                  pl.BlockSpec((tk, tn), lambda j, k: (k, j)),   # W2 K/N tile
                  pl.BlockSpec((8, tn), lambda j, k: (0, j))],   # packed BN params
        out_specs=pl.BlockSpec((N, tn), lambda j, k: (0, j)),
        compiler_params=compiler_params,
        cost_estimate=cost2,
    )(h, x_p, w2p, params)

    return y if D == Dp else y[:, :D]


def resblock(x, w1p, w2p, params):
    """x: (N, D) float; w1p/w2p/params from pack_resblock_params()."""
    try:
        return _resblock_impl(x, w1p, w2p, params, single_buffer_resident=True)
    except Exception:
        # pl.Buffered(1) not accepted by this jax/Mosaic build: default buffering.
        return _resblock_impl(x, w1p, w2p, params, single_buffer_resident=False)


def _reference(x, w1_t, b1, g1, be1, w2_t, b2, g2, be2):
    # Ground-truth PyTorch math: biases included, two-pass batch statistics.
    def bn(h, gamma, beta):
        mean = jnp.mean(h, axis=0, keepdims=True)
        var = jnp.mean((h - mean) * (h - mean), axis=0, keepdims=True)
        return gamma * (h - mean) * lax.rsqrt(var + _EPS) + beta

    h = x @ w1_t + b1
    h = _gelu_exact(bn(h, g1, be1))
    h = h @ w2_t + b2
    h = bn(h, g2, be2)
    return _gelu_exact(x + h)


if __name__ == "__main__":
    N, D = 8, 32  # batch=8, dim=32
    key = jax.random.PRNGKey(0)
    kx, kw1, kb1, kw2, kb2 = jax.random.split(key, 5)

    x = jax.random.normal(kx, (N, D), dtype=jnp.float32)

    # nn.Linear(dim, dim): weight (out, in), bias (out,).  Pre-transpose to (in, out).
    bound = D ** -0.5
    w1 = jax.random.uniform(kw1, (D, D), minval=-bound, maxval=bound, dtype=jnp.float32)
    b1 = jax.random.uniform(kb1, (1, D), minval=-bound, maxval=bound, dtype=jnp.float32)
    w2 = jax.random.uniform(kw2, (D, D), minval=-bound, maxval=bound, dtype=jnp.float32)
    b2 = jax.random.uniform(kb2, (1, D), minval=-bound, maxval=bound, dtype=jnp.float32)
    w1_t, w2_t = w1.T, w2.T

    # nn.BatchNorm1d(dim): gamma=1, beta=0 at init.
    g1 = jnp.ones((1, D), jnp.float32)
    be1 = jnp.zeros((1, D), jnp.float32)
    g2 = jnp.ones((1, D), jnp.float32)
    be2 = jnp.zeros((1, D), jnp.float32)

    ref = _reference(x, w1_t, b1, g1, be1, w2_t, b2, g2, be2)

    # Path 1: f32 weights (bit-faithful) -- tight tolerance.
    w1p, w2p, params = pack_resblock_params(w1_t, g1, be1, w2_t, g2, be2,
                                            weight_dtype=jnp.float32)
    out_f32 = jax.block_until_ready(resblock(x, w1p, w2p, params))
    assert out_f32.shape == (N, D)
    assert jnp.allclose(out_f32, ref, atol=2e-5, rtol=2e-5), "f32 mismatch vs reference"

    # Path 2: bf16 weights (halved weight HBM traffic; BN re-normalizes, so the
    # error stays small) -- looser tolerance.
    w1b, w2b, params_b = pack_resblock_params(w1_t, g1, be1, w2_t, g2, be2,
                                              weight_dtype=jnp.bfloat16)
    out_bf16 = jax.block_until_ready(resblock(x, w1b, w2b, params_b))
    assert out_bf16.shape == (N, D)
    assert jnp.allclose(out_bf16, ref, atol=3e-2, rtol=3e-2), "bf16 mismatch vs reference"

    print("KERNEL_OK")
</pallas_src>

<mosaic_0001>
module attributes {stable_mosaic.version = 11 : i64} {
  func.func @_stage1_kernel(%arg0: i32, %arg1: i32, %arg2: memref<8x128xf32, #tpu.memory_space<vmem>>, %arg3: memref<128x128xf32, #tpu.memory_space<vmem>>, %arg4: memref<8x128xf32, #tpu.memory_space<vmem>>, %arg5: memref<8x128xf32, #tpu.memory_space<vmem>>) attributes {dimension_semantics = [#tpu.dimension_semantics<parallel>, #tpu.dimension_semantics<arbitrary>], iteration_bounds = array<i64: 1, 1>, scalar_prefetch = 0 : i64, scratch_operands = 0 : i64, tpu.core_type = #tpu.core_type<tc>, window_params = [{pipeline_mode = #tpu.pipeline_mode<synchronous>, transform_indices = @transform_0, window_bounds = array<i64: 8, 128>}, {transform_indices = @transform_1, window_bounds = array<i64: 128, 128>}, {transform_indices = @transform_2, window_bounds = array<i64: 8, 128>}, {transform_indices = @transform_3, window_bounds = array<i64: 8, 128>}]} {
    %c0_i32 = arith.constant 0 : i32
    %0 = arith.cmpi eq, %arg1, %c0_i32 : i32
    %1 = arith.extui %0 : i1 to i32
    %c0_i32_0 = arith.constant 0 : i32
    %2 = arith.cmpi ne, %1, %c0_i32_0 : i32
    scf.if %2 {
      %cst_9 = arith.constant 0.000000e+00 : f32
      %15 = vector.broadcast %cst_9 : f32 to vector<8x128xf32>
      %c0_10 = arith.constant 0 : index
      %c0_11 = arith.constant 0 : index
      %16 = vector.load %arg5[%c0_10, %c0_11] : memref<8x128xf32, #tpu.memory_space<vmem>>, vector<8x128xf32>
      tpu.vector_store %arg5[%c0_10, %c0_11], %15 {strides = array<i32>} : memref<8x128xf32, #tpu.memory_space<vmem>>, vector<8x128xf32>,
    } else {
    }
    %c128_i32 = arith.constant 128 : i32
    %3 = arith.muli %arg1, %c128_i32 : i32
    %4 = tpu.assume_multiple %3, 128 : i32
    %c0 = arith.constant 0 : index
    %5 = arith.index_cast %4 : i32 to index
    %6 = vector.load %arg2[%c0, %5] : memref<8x128xf32, #tpu.memory_space<vmem>>, vector<8x128xf32>
    %c0_1 = arith.constant 0 : index
    %c0_2 = arith.constant 0 : index
    %7 = vector.load %arg5[%c0_1, %c0_2] : memref<8x128xf32, #tpu.memory_space<vmem>>, vector<8x128xf32>
    %c0_3 = arith.constant 0 : index
    %c0_4 = arith.constant 0 : index
    %8 = vector.load %arg3[%c0_3, %c0_4] : memref<128x128xf32, #tpu.memory_space<vmem>>, vector<128x128xf32>
    %cst = arith.constant dense<0.000000e+00> : vector<8x128xf32>
    %9 = tpu.matmul %6, %8, %cst {dimension_numbers = #tpu.dot_dimension_numbers<[1], [0], [0], [1], [0, 0, 1, 1], [], []>} : vector<8x128xf32>, vector<128x128xf32>, vector<8x128xf32> -> vector<8x128xf32>
    %10 = arith.addf %7, %9 : vector<8x128xf32>
    %c0_5 = arith.constant 0 : index
    %c0_6 = arith.constant 0 : index
    %11 = vector.load %arg5[%c0_5, %c0_6] : memref<8x128xf32, #tpu.memory_space<vmem>>, vector<8x128xf32>
    tpu.vector_store %arg5[%c0_5, %c0_6], %10 {strides = array<i32>} : memref<8x128xf32, #tpu.memory_space<vmem>>, vector<8x128xf32>,
    %c0_i32_7 = arith.constant 0 : i32
    %12 = arith.cmpi eq, %arg1, %c0_i32_7 : i32
    %13 = arith.extui %12 : i1 to i32
    %c0_i32_8 = arith.constant 0 : i32
    %14 = arith.cmpi ne, %13, %c0_i32_8 : i32
    scf.if %14 {
      %c0_9 = arith.constant 0 : index
      %c0_10 = arith.constant 0 : index
      %15 = vector.load %arg5[%c0_9, %c0_10] : memref<8x128xf32, #tpu.memory_space<vmem>>, vector<8x128xf32>
      %c0_11 = arith.constant 0 : index
      %c0_12 = arith.constant 0 : index
      %16 = vector.load %arg4[%c0_11, %c0_12] : memref<8x128xf32, #tpu.memory_space<vmem>>, vector<1x128xf32>
      %c1 = arith.constant 1 : index
      %c0_13 = arith.constant 0 : index
      %17 = vector.load %arg4[%c1, %c0_13] : memref<8x128xf32, #tpu.memory_space<vmem>>, vector<1x128xf32>
      %cst_14 = arith.constant dense<0.000000e+00> : vector<128xf32>
      %18 = vector.multi_reduction <add>, %15, %cst_14 [0] : vector<8x128xf32> to vector<128xf32>
      %19 = vector.shape_cast %18 : vector<128xf32> to vector<1x128xf32>
      %20 = arith.mulf %15, %15 : vector<8x128xf32>
      %cst_15 = arith.constant dense<0.000000e+00> : vector<128xf32>
      %21 = vector.multi_reduction <add>, %20, %cst_15 [0] : vector<8x128xf32> to vector<128xf32>
      %22 = vector.shape_cast %21 : vector<128xf32> to vector<1x128xf32>
      %cst_16 = arith.constant 1.250000e-01 : f32
      %23 = vector.broadcast %cst_16 : f32 to vector<1x128xf32>
      %24 = arith.mulf %19, %23 : vector<1x128xf32>
      %cst_17 = arith.constant 1.250000e-01 : f32
      %25 = vector.broadcast %cst_17 : f32 to vector<1x128xf32>
      %26 = arith.mulf %22, %25 : vector<1x128xf32>
      %27 = arith.mulf %24, %24 : vector<1x128xf32>
      %28 = arith.subf %26, %27 : vector<1x128xf32>
      %cst_18 = arith.constant 0.000000e+00 : f32
      %29 = vector.broadcast %cst_18 : f32 to vector<1x128xf32>
      %30 = arith.maximumf %28, %29 : vector<1x128xf32>
      %cst_19 = arith.constant 9.99999974E-6 : f32
      %31 = vector.broadcast %cst_19 : f32 to vector<1x128xf32>
      %32 = arith.addf %30, %31 : vector<1x128xf32>
      %33 = math.rsqrt %32 : vector<1x128xf32>
      %34 = arith.mulf %16, %33 : vector<1x128xf32>
      %35 = arith.mulf %24, %34 : vector<1x128xf32>
      %36 = arith.subf %17, %35 : vector<1x128xf32>
      %37 = vector.broadcast %34 : vector<1x128xf32> to vector<8x128xf32>
      %38 = arith.mulf %15, %37 : vector<8x128xf32>
      %39 = vector.broadcast %36 : vector<1x128xf32> to vector<8x128xf32>
      %40 = arith.addf %38, %39 : vector<8x128xf32>
      %cst_20 = arith.constant 5.000000e-01 : f32
      %41 = vector.broadcast %cst_20 : f32 to vector<8x128xf32>
      %42 = arith.mulf %41, %40 : vector<8x128xf32>
      %cst_21 = arith.constant 0.707106769 : f32
      %43 = vector.broadcast %cst_21 : f32 to vector<8x128xf32>
      %44 = arith.mulf %40, %43 : vector<8x128xf32>
      %45 = math.erf %44 : vector<8x128xf32>
      %cst_22 = arith.constant 1.000000e+00 : f32
      %46 = vector.broadcast %cst_22 : f32 to vector<8x128xf32>
      %47 = arith.addf %46, %45 : vector<8x128xf32>
      %48 = arith.mulf %42, %47 : vector<8x128xf32>
      %c0_23 = arith.constant 0 : index
      %c0_24 = arith.constant 0 : index
      %49 = vector.load %arg5[%c0_23, %c0_24] : memref<8x128xf32, #tpu.memory_space<vmem>>, vector<8x128xf32>
      tpu.vector_store %arg5[%c0_23, %c0_24], %48 {strides = array<i32>} : memref<8x128xf32, #tpu.memory_space<vmem>>, vector<8x128xf32>,
    } else {
    }
    return
  }
  func.func @transform_0(%arg0: i32, %arg1: i32) -> (i32, i32) {
    %c0_i32 = arith.constant 0 : i32
    %c0_i32_0 = arith.constant 0 : i32
    %c0_i32_1 = arith.constant 0 : i32
    return %c0_i32, %c0_i32_0 : i32, i32
  }
  func.func @transform_1(%arg0: i32, %arg1: i32) -> (i32, i32) {
    %c0_i32 = arith.constant 0 : i32
    return %arg1, %arg0 : i32, i32
  }
  func.func @transform_2(%arg0: i32, %arg1: i32) -> (i32, i32) {
    %c0_i32 = arith.constant 0 : i32
    %c0_i32_0 = arith.constant 0 : i32
    return %c0_i32, %arg0 : i32, i32
  }
  func.func @transform_3(%arg0: i32, %arg1: i32) -> (i32, i32) {
    %c0_i32 = arith.constant 0 : i32
    %c0_i32_0 = arith.constant 0 : i32
    return %c0_i32, %arg0 : i32, i32
  }
}

module attributes {stable_mosaic.version = 11 : i64} {
  func.func @_stage2_kernel(%arg0: i32, %arg1: i32, %arg2: memref<8x128xf32, #tpu.memory_space<vmem>>, %arg3: memref<8x128xf32, #tpu.memory_space<vmem>>, %arg4: memref<128x128xf32, #tpu.memory_space<vmem>>, %arg5: memref<8x128xf32, #tpu.memory_space<vmem>>, %arg6: memref<8x128xf32, #tpu.memory_space<vmem>>) attributes {dimension_semantics = [#tpu.dimension_semantics<parallel>, #tpu.dimension_semantics<arbitrary>], iteration_bounds = array<i64: 1, 1>, scalar_prefetch = 0 : i64, scratch_operands = 0 : i64, tpu.core_type = #tpu.core_type<tc>, window_params = [{pipeline_mode = #tpu.pipeline_mode<synchronous>, transform_indices = @transform_0, window_bounds = array<i64: 8, 128>}, {transform_indices = @transform_1, window_bounds = array<i64: 8, 128>}, {transform_indices = @transform_2, window_bounds = array<i64: 128, 128>}, {transform_indices = @transform_3, window_bounds = array<i64: 8, 128>}, {transform_indices = @transform_4, window_bounds = array<i64: 8, 128>}]} {
    %c0_i32 = arith.constant 0 : i32
    %0 = arith.cmpi eq, %arg1, %c0_i32 : i32
    %1 = arith.extui %0 : i1 to i32
    %c0_i32_0 = arith.constant 0 : i32
    %2 = arith.cmpi ne, %1, %c0_i32_0 : i32
    scf.if %2 {
      %cst_9 = arith.constant 0.000000e+00 : f32
      %15 = vector.broadcast %cst_9 : f32 to vector<8x128xf32>
      %c0_10 = arith.constant 0 : index
      %c0_11 = arith.constant 0 : index
      %16 = vector.load %arg6[%c0_10, %c0_11] : memref<8x128xf32, #tpu.memory_space<vmem>>, vector<8x128xf32>
      tpu.vector_store %arg6[%c0_10, %c0_11], %15 {strides = array<i32>} : memref<8x128xf32, #tpu.memory_space<vmem>>, vector<8x128xf32>,
    } else {
    }
    %c128_i32 = arith.constant 128 : i32
    %3 = arith.muli %arg1, %c128_i32 : i32
    %4 = tpu.assume_multiple %3, 128 : i32
    %c0 = arith.constant 0 : index
    %5 = arith.index_cast %4 : i32 to index
    %6 = vector.load %arg2[%c0, %5] : memref<8x128xf32, #tpu.memory_space<vmem>>, vector<8x128xf32>
    %c0_1 = arith.constant 0 : index
    %c0_2 = arith.constant 0 : index
    %7 = vector.load %arg6[%c0_1, %c0_2] : memref<8x128xf32, #tpu.memory_space<vmem>>, vector<8x128xf32>
    %c0_3 = arith.constant 0 : index
    %c0_4 = arith.constant 0 : index
    %8 = vector.load %arg4[%c0_3, %c0_4] : memref<128x128xf32, #tpu.memory_space<vmem>>, vector<128x128xf32>
    %cst = arith.constant dense<0.000000e+00> : vector<8x128xf32>
    %9 = tpu.matmul %6, %8, %cst {dimension_numbers = #tpu.dot_dimension_numbers<[1], [0], [0], [1], [0, 0, 1, 1], [], []>} : vector<8x128xf32>, vector<128x128xf32>, vector<8x128xf32> -> vector<8x128xf32>
    %10 = arith.addf %7, %9 : vector<8x128xf32>
    %c0_5 = arith.constant 0 : index
    %c0_6 = arith.constant 0 : index
    %11 = vector.load %arg6[%c0_5, %c0_6] : memref<8x128xf32, #tpu.memory_space<vmem>>, vector<8x128xf32>
    tpu.vector_store %arg6[%c0_5, %c0_6], %10 {strides = array<i32>} : memref<8x128xf32, #tpu.memory_space<vmem>>, vector<8x128xf32>,
    %c0_i32_7 = arith.constant 0 : i32
    %12 = arith.cmpi eq, %arg1, %c0_i32_7 : i32
    %13 = arith.extui %12 : i1 to i32
    %c0_i32_8 = arith.constant 0 : i32
    %14 = arith.cmpi ne, %13, %c0_i32_8 : i32
    scf.if %14 {
      %c0_9 = arith.constant 0 : index
      %c0_10 = arith.constant 0 : index
      %15 = vector.load %arg3[%c0_9, %c0_10] : memref<8x128xf32, #tpu.memory_space<vmem>>, vector<8x128xf32>
      %c0_11 = arith.constant 0 : index
      %c0_12 = arith.constant 0 : index
      %16 = vector.load %arg6[%c0_11, %c0_12] : memref<8x128xf32, #tpu.memory_space<vmem>>, vector<8x128xf32>
      %c2 = arith.constant 2 : index
      %c0_13 = arith.constant 0 : index
      %17 = vector.load %arg5[%c2, %c0_13] : memref<8x128xf32, #tpu.memory_space<vmem>>, vector<1x128xf32>
      %c3 = arith.constant 3 : index
      %c0_14 = arith.constant 0 : index
      %18 = vector.load %arg5[%c3, %c0_14] : memref<8x128xf32, #tpu.memory_space<vmem>>, vector<1x128xf32>
      %cst_15 = arith.constant dense<0.000000e+00> : vector<128xf32>
      %19 = vector.multi_reduction <add>, %16, %cst_15 [0] : vector<8x128xf32> to vector<128xf32>
      %20 = vector.shape_cast %19 : vector<128xf32> to vector<1x128xf32>
      %21 = arith.mulf %16, %16 : vector<8x128xf32>
      %cst_16 = arith.constant dense<0.000000e+00> : vector<128xf32>
      %22 = vector.multi_reduction <add>, %21, %cst_16 [0] : vector<8x128xf32> to vector<128xf32>
      %23 = vector.shape_cast %22 : vector<128xf32> to vector<1x128xf32>
      %cst_17 = arith.constant 1.250000e-01 : f32
      %24 = vector.broadcast %cst_17 : f32 to vector<1x128xf32>
      %25 = arith.mulf %20, %24 : vector<1x128xf32>
      %cst_18 = arith.constant 1.250000e-01 : f32
      %26 = vector.broadcast %cst_18 : f32 to vector<1x128xf32>
      %27 = arith.mulf %23, %26 : vector<1x128xf32>
      %28 = arith.mulf %25, %25 : vector<1x128xf32>
      %29 = arith.subf %27, %28 : vector<1x128xf32>
      %cst_19 = arith.constant 0.000000e+00 : f32
      %30 = vector.broadcast %cst_19 : f32 to vector<1x128xf32>
      %31 = arith.maximumf %29, %30 : vector<1x128xf32>
      %cst_20 = arith.constant 9.99999974E-6 : f32
      %32 = vector.broadcast %cst_20 : f32 to vector<1x128xf32>
      %33 = arith.addf %31, %32 : vector<1x128xf32>
      %34 = math.rsqrt %33 : vector<1x128xf32>
      %35 = arith.mulf %17, %34 : vector<1x128xf32>
      %36 = arith.mulf %25, %35 : vector<1x128xf32>
      %37 = arith.subf %18, %36 : vector<1x128xf32>
      %38 = vector.broadcast %35 : vector<1x128xf32> to vector<8x128xf32>
      %39 = arith.mulf %16, %38 : vector<8x128xf32>
      %40 = vector.broadcast %37 : vector<1x128xf32> to vector<8x128xf32>
      %41 = arith.addf %39, %40 : vector<8x128xf32>
      %42 = arith.addf %15, %41 : vector<8x128xf32>
      %cst_21 = arith.constant 5.000000e-01 : f32
      %43 = vector.broadcast %cst_21 : f32 to vector<8x128xf32>
      %44 = arith.mulf %43, %42 : vector<8x128xf32>
      %cst_22 = arith.constant 0.707106769 : f32
      %45 = vector.broadcast %cst_22 : f32 to vector<8x128xf32>
      %46 = arith.mulf %42, %45 : vector<8x128xf32>
      %47 = math.erf %46 : vector<8x128xf32>
      %cst_23 = arith.constant 1.000000e+00 : f32
      %48 = vector.broadcast %cst_23 : f32 to vector<8x128xf32>
      %49 = arith.addf %48, %47 : vector<8x128xf32>
      %50 = arith.mulf %44, %49 : vector<8x128xf32>
      %c0_24 = arith.constant 0 : index
      %c0_25 = arith.constant 0 : index
      %51 = vector.load %arg6[%c0_24, %c0_25] : memref<8x128xf32, #tpu.memory_space<vmem>>, vector<8x128xf32>
      tpu.vector_store %arg6[%c0_24, %c0_25], %50 {strides = array<i32>} : memref<8x128xf32, #tpu.memory_space<vmem>>, vector<8x128xf32>,
    } else {
    }
    return
  }
  func.func @transform_0(%arg0: i32, %arg1: i32) -> (i32, i32) {
    %c0_i32 = arith.constant 0 : i32
    %c0_i32_0 = arith.constant 0 : i32
    %c0_i32_1 = arith.constant 0 : i32
    return %c0_i32, %c0_i32_0 : i32, i32
  }
  func.func @transform_1(%arg0: i32, %arg1: i32) -> (i32, i32) {
    %c0_i32 = arith.constant 0 : i32
    %c0_i32_0 = arith.constant 0 : i32
    return %c0_i32, %arg0 : i32, i32
  }
  func.func @transform_2(%arg0: i32, %arg1: i32) -> (i32, i32) {
    %c0_i32 = arith.constant 0 : i32
    return %arg1, %arg0 : i32, i32
  }
  func.func @transform_3(%arg0: i32, %arg1: i32) -> (i32, i32) {
    %c0_i32 = arith.constant 0 : i32
    %c0_i32_0 = arith.constant 0 : i32
    return %c0_i32, %arg0 : i32, i32
  }
  func.func @transform_4(%arg0: i32, %arg1: i32) -> (i32, i32) {
    %c0_i32 = arith.constant 0 : i32
    %c0_i32_0 = arith.constant 0 : i32
    return %c0_i32, %arg0 : i32, i32
  }
}

module attributes {stable_mosaic.version = 11 : i64} {
  func.func @_stage2_kernel(%arg0: i32, %arg1: i32, %arg2: memref<8x128xf32, #tpu.memory_space<vmem>>, %arg3: memref<8x128xf32, #tpu.memory_space<vmem>>, %arg4: memref<128x128xf32, #tpu.memory_space<vmem>>, %arg5: memref<8x128xf32, #tpu.memory_space<vmem>>, %arg6: memref<8x128xf32, #tpu.memory_space<vmem>>) attributes {dimension_semantics = [#tpu.dimension_semantics<parallel>, #tpu.dimension_semantics<arbitrary>], iteration_bounds = array<i64: 1, 1>, scalar_prefetch = 0 : i64, scratch_operands = 0 : i64, tpu.core_type = #tpu.core_type<tc>, window_params = [{pipeline_mode = #tpu.pipeline_mode<synchronous>, transform_indices = @transform_0, window_bounds = array<i64: 8, 128>}, {transform_indices = @transform_1, window_bounds = array<i64: 8, 128>}, {transform_indices = @transform_2, window_bounds = array<i64: 128, 128>}, {transform_indices = @transform_3, window_bounds = array<i64: 8, 128>}, {transform_indices = @transform_4, window_bounds = array<i64: 8, 128>}]} {
    %c0_i32 = arith.constant 0 : i32
    %0 = arith.cmpi eq, %arg1, %c0_i32 : i32
    %1 = arith.extui %0 : i1 to i32
    %c0_i32_0 = arith.constant 0 : i32
    %2 = arith.cmpi ne, %1, %c0_i32_0 : i32
    scf.if %2 {
      %cst_9 = arith.constant 0.000000e+00 : f32
      %15 = vector.broadcast %cst_9 : f32 to vector<8x128xf32>
      %c0_10 = arith.constant 0 : index
      %c0_11 = arith.constant 0 : index
      %16 = vector.load %arg6[%c0_10, %c0_11] : memref<8x128xf32, #tpu.memory_space<vmem>>, vector<8x128xf32>
      tpu.vector_store %arg6[%c0_10, %c0_11], %15 {strides = array<i32>} : memref<8x128xf32, #tpu.memory_space<vmem>>, vector<8x128xf32>,
    } else {
    }
    %c128_i32 = arith.constant 128 : i32
    %3 = arith.muli %arg1, %c128_i32 : i32
    %4 = tpu.assume_multiple %3, 128 : i32
    %c0 = arith.constant 0 : index
    %5 = arith.index_cast %4 : i32 to index
    %6 = vector.load %arg2[%c0, %5] : memref<8x128xf32, #tpu.memory_space<vmem>>, vector<8x128xf32>
    %c0_1 = arith.constant 0 : index
    %c0_2 = arith.constant 0 : index
    %7 = vector.load %arg6[%c0_1, %c0_2] : memref<8x128xf32, #tpu.memory_space<vmem>>, vector<8x128xf32>
    %c0_3 = arith.constant 0 : index
    %c0_4 = arith.constant 0 : index
    %8 = vector.load %arg4[%c0_3, %c0_4] : memref<128x128xf32, #tpu.memory_space<vmem>>, vector<128x128xf32>
    %cst = arith.constant dense<0.000000e+00> : vector<8x128xf32>
    %9 = tpu.matmul %6, %8, %cst {dimension_numbers = #tpu.dot_dimension_numbers<[1], [0], [0], [1], [0, 0, 1, 1], [], []>} : vector<8x128xf32>, vector<128x128xf32>, vector<8x128xf32> -> vector<8x128xf32>
    %10 = arith.addf %7, %9 : vector<8x128xf32>
    %c0_5 = arith.constant 0 : index
    %c0_6 = arith.constant 0 : index
    %11 = vector.load %arg6[%c0_5, %c0_6] : memref<8x128xf32, #tpu.memory_space<vmem>>, vector<8x128xf32>
    tpu.vector_store %arg6[%c0_5, %c0_6], %10 {strides = array<i32>} : memref<8x128xf32, #tpu.memory_space<vmem>>, vector<8x128xf32>,
    %c0_i32_7 = arith.constant 0 : i32
    %12 = arith.cmpi eq, %arg1, %c0_i32_7 : i32
    %13 = arith.extui %12 : i1 to i32
    %c0_i32_8 = arith.constant 0 : i32
    %14 = arith.cmpi ne, %13, %c0_i32_8 : i32
    scf.if %14 {
      %c0_9 = arith.constant 0 : index
      %c0_10 = arith.constant 0 : index
      %15 = vector.load %arg3[%c0_9, %c0_10] : memref<8x128xf32, #tpu.memory_space<vmem>>, vector<8x128xf32>
      %c0_11 = arith.constant 0 : index
      %c0_12 = arith.constant 0 : index
      %16 = vector.load %arg6[%c0_11, %c0_12] : memref<8x128xf32, #tpu.memory_space<vmem>>, vector<8x128xf32>
      %c2 = arith.constant 2 : index
      %c0_13 = arith.constant 0 : index
      %17 = vector.load %arg5[%c2, %c0_13] : memref<8x128xf32, #tpu.memory_space<vmem>>, vector<1x128xf32>
      %c3 = arith.constant 3 : index
      %c0_14 = arith.constant 0 : index
      %18 = vector.load %arg5[%c3, %c0_14] : memref<8x128xf32, #tpu.memory_space<vmem>>, vector<1x128xf32>
      %cst_15 = arith.constant dense<0.000000e+00> : vector<128xf32>
      %19 = vector.multi_reduction <add>, %16, %cst_15 [0] : vector<8x128xf32> to vector<128xf32>
      %20 = vector.shape_cast %19 : vector<128xf32> to vector<1x128xf32>
      %21 = arith.mulf %16, %16 : vector<8x128xf32>
      %cst_16 = arith.constant dense<0.000000e+00> : vector<128xf32>
      %22 = vector.multi_reduction <add>, %21, %cst_16 [0] : vector<8x128xf32> to vector<128xf32>
      %23 = vector.shape_cast %22 : vector<128xf32> to vector<1x128xf32>
      %cst_17 = arith.constant 1.250000e-01 : f32
      %24 = vector.broadcast %cst_17 : f32 to vector<1x128xf32>
      %25 = arith.mulf %20, %24 : vector<1x128xf32>
      %cst_18 = arith.constant 1.250000e-01 : f32
      %26 = vector.broadcast %cst_18 : f32 to vector<1x128xf32>
      %27 = arith.mulf %23, %26 : vector<1x128xf32>
      %28 = arith.mulf %25, %25 : vector<1x128xf32>
      %29 = arith.subf %27, %28 : vector<1x128xf32>
      %cst_19 = arith.constant 0.000000e+00 : f32
      %30 = vector.broadcast %cst_19 : f32 to vector<1x128xf32>
      %31 = arith.maximumf %29, %30 : vector<1x128xf32>
      %cst_20 = arith.constant 9.99999974E-6 : f32
      %32 = vector.broadcast %cst_20 : f32 to vector<1x128xf32>
      %33 = arith.addf %31, %32 : vector<1x128xf32>
      %34 = math.rsqrt %33 : vector<1x128xf32>
      %35 = arith.mulf %17, %34 : vector<1x128xf32>
      %36 = arith.mulf %25, %35 : vector<1x128xf32>
      %37 = arith.subf %18, %36 : vector<1x128xf32>
      %38 = vector.broadcast %35 : vector<1x128xf32> to vector<8x128xf32>
      %39 = arith.mulf %16, %38 : vector<8x128xf32>
      %40 = vector.broadcast %37 : vector<1x128xf32> to vector<8x128xf32>
      %41 = arith.addf %39, %40 : vector<8x128xf32>
      %42 = arith.addf %15, %41 : vector<8x128xf32>
      %cst_21 = arith.constant 5.000000e-01 : f32
      %43 = vector.broadcast %cst_21 : f32 to vector<8x128xf32>
      %44 = arith.mulf %43, %42 : vector<8x128xf32>
      %cst_22 = arith.constant 0.707106769 : f32
      %45 = vector.broadcast %cst_22 : f32 to vector<8x128xf32>
      %46 = arith.mulf %42, %45 : vector<8x128xf32>
      %47 = math.erf %46 : vector<8x128xf32>
      %cst_23 = arith.constant 1.000000e+00 : f32
      %48 = vector.broadcast %cst_23 : f32 to vector<8x128xf32>
      %49 = arith.addf %48, %47 : vector<8x128xf32>
      %50 = arith.mulf %44, %49 : vector<8x128xf32>
      %c0_24 = arith.constant 0 : index
      %c0_25 = arith.constant 0 : index
      %51 = vector.load %arg6[%c0_24, %c0_25] : memref<8x128xf32, #tpu.memory_space<vmem>>, vector<8x128xf32>
      tpu.vector_store %arg6[%c0_24, %c0_25], %50 {strides = array<i32>} : memref<8x128xf32, #tpu.memory_space<vmem>>, vector<8x128xf32>,
    } else {
    }
    return
  }
  func.func @transform_0(%arg0: i32, %arg1: i32) -> (i32, i32) {
    %c0_i32 = arith.constant 0 : i32
    %c0_i32_0 = arith.constant 0 : i32
    %c0_i32_1 = arith.constant 0 : i32
    return %c0_i32, %c0_i32_0 : i32, i32
  }
  func.func @transform_1(%arg0: i32, %arg1: i32) -> (i32, i32) {
    %c0_i32 = arith.constant 0 : i32
    %c0_i32_0 = arith.constant 0 : i32
    return %c0_i32, %arg0 : i32, i32
  }
  func.func @transform_2(%arg0: i32, %arg1: i32) -> (i32, i32) {
    %c0_i32 = arith.constant 0 : i32
    return %arg1, %arg0 : i32, i32
  }
  func.func @transform_3(%arg0: i32, %arg1: i32) -> (i32, i32) {
    %c0_i32 = arith.constant 0 : i32
    %c0_i32_0 = arith.constant 0 : i32
    return %c0_i32, %arg0 : i32, i32
  }
  func.func @transform_4(%arg0: i32, %arg1: i32) -> (i32, i32) {
    %c0_i32 = arith.constant 0 : i32
    %c0_i32_0 = arith.constant 0 : i32
    return %c0_i32, %arg0 : i32, i32
  }
}

module attributes {stable_mosaic.version = 11 : i64} {
  func.func @_stage1_kernel(%arg0: i32, %arg1: i32, %arg2: memref<8x128xf32, #tpu.memory_space<vmem>>, %arg3: memref<128x128xf32, #tpu.memory_space<vmem>>, %arg4: memref<8x128xf32, #tpu.memory_space<vmem>>, %arg5: memref<8x128xf32, #tpu.memory_space<vmem>>) attributes {dimension_semantics = [#tpu.dimension_semantics<parallel>, #tpu.dimension_semantics<arbitrary>], iteration_bounds = array<i64: 1, 1>, scalar_prefetch = 0 : i64, scratch_operands = 0 : i64, tpu.core_type = #tpu.core_type<tc>, window_params = [{pipeline_mode = #tpu.pipeline_mode<synchronous>, transform_indices = @transform_0, window_bounds = array<i64: 8, 128>}, {transform_indices = @transform_1, window_bounds = array<i64: 128, 128>}, {transform_indices = @transform_2, window_bounds = array<i64: 8, 128>}, {transform_indices = @transform_3, window_bounds = array<i64: 8, 128>}]} {
    %c0_i32 = arith.constant 0 : i32
    %0 = arith.cmpi eq, %arg1, %c0_i32 : i32
    %1 = arith.extui %0 : i1 to i32
    %c0_i32_0 = arith.constant 0 : i32
    %2 = arith.cmpi ne, %1, %c0_i32_0 : i32
    scf.if %2 {
      %cst_9 = arith.constant 0.000000e+00 : f32
      %15 = vector.broadcast %cst_9 : f32 to vector<8x128xf32>
      %c0_10 = arith.constant 0 : index
      %c0_11 = arith.constant 0 : index
      %16 = vector.load %arg5[%c0_10, %c0_11] : memref<8x128xf32, #tpu.memory_space<vmem>>, vector<8x128xf32>
      tpu.vector_store %arg5[%c0_10, %c0_11], %15 {strides = array<i32>} : memref<8x128xf32, #tpu.memory_space<vmem>>, vector<8x128xf32>,
    } else {
    }
    %c128_i32 = arith.constant 128 : i32
    %3 = arith.muli %arg1, %c128_i32 : i32
    %4 = tpu.assume_multiple %3, 128 : i32
    %c0 = arith.constant 0 : index
    %5 = arith.index_cast %4 : i32 to index
    %6 = vector.load %arg2[%c0, %5] : memref<8x128xf32, #tpu.memory_space<vmem>>, vector<8x128xf32>
    %c0_1 = arith.constant 0 : index
    %c0_2 = arith.constant 0 : index
    %7 = vector.load %arg5[%c0_1, %c0_2] : memref<8x128xf32, #tpu.memory_space<vmem>>, vector<8x128xf32>
    %c0_3 = arith.constant 0 : index
    %c0_4 = arith.constant 0 : index
    %8 = vector.load %arg3[%c0_3, %c0_4] : memref<128x128xf32, #tpu.memory_space<vmem>>, vector<128x128xf32>
    %cst = arith.constant dense<0.000000e+00> : vector<8x128xf32>
    %9 = tpu.matmul %6, %8, %cst {dimension_numbers = #tpu.dot_dimension_numbers<[1], [0], [0], [1], [0, 0, 1, 1], [], []>} : vector<8x128xf32>, vector<128x128xf32>, vector<8x128xf32> -> vector<8x128xf32>
    %10 = arith.addf %7, %9 : vector<8x128xf32>
    %c0_5 = arith.constant 0 : index
    %c0_6 = arith.constant 0 : index
    %11 = vector.load %arg5[%c0_5, %c0_6] : memref<8x128xf32, #tpu.memory_space<vmem>>, vector<8x128xf32>
    tpu.vector_store %arg5[%c0_5, %c0_6], %10 {strides = array<i32>} : memref<8x128xf32, #tpu.memory_space<vmem>>, vector<8x128xf32>,
    %c0_i32_7 = arith.constant 0 : i32
    %12 = arith.cmpi eq, %arg1, %c0_i32_7 : i32
    %13 = arith.extui %12 : i1 to i32
    %c0_i32_8 = arith.constant 0 : i32
    %14 = arith.cmpi ne, %13, %c0_i32_8 : i32
    scf.if %14 {
      %c0_9 = arith.constant 0 : index
      %c0_10 = arith.constant 0 : index
      %15 = vector.load %arg5[%c0_9, %c0_10] : memref<8x128xf32, #tpu.memory_space<vmem>>, vector<8x128xf32>
      %c0_11 = arith.constant 0 : index
      %c0_12 = arith.constant 0 : index
      %16 = vector.load %arg4[%c0_11, %c0_12] : memref<8x128xf32, #tpu.memory_space<vmem>>, vector<1x128xf32>
      %c1 = arith.constant 1 : index
      %c0_13 = arith.constant 0 : index
      %17 = vector.load %arg4[%c1, %c0_13] : memref<8x128xf32, #tpu.memory_space<vmem>>, vector<1x128xf32>
      %cst_14 = arith.constant dense<0.000000e+00> : vector<128xf32>
      %18 = vector.multi_reduction <add>, %15, %cst_14 [0] : vector<8x128xf32> to vector<128xf32>
      %19 = vector.shape_cast %18 : vector<128xf32> to vector<1x128xf32>
      %20 = arith.mulf %15, %15 : vector<8x128xf32>
      %cst_15 = arith.constant dense<0.000000e+00> : vector<128xf32>
      %21 = vector.multi_reduction <add>, %20, %cst_15 [0] : vector<8x128xf32> to vector<128xf32>
      %22 = vector.shape_cast %21 : vector<128xf32> to vector<1x128xf32>
      %cst_16 = arith.constant 1.250000e-01 : f32
      %23 = vector.broadcast %cst_16 : f32 to vector<1x128xf32>
      %24 = arith.mulf %19, %23 : vector<1x128xf32>
      %cst_17 = arith.constant 1.250000e-01 : f32
      %25 = vector.broadcast %cst_17 : f32 to vector<1x128xf32>
      %26 = arith.mulf %22, %25 : vector<1x128xf32>
      %27 = arith.mulf %24, %24 : vector<1x128xf32>
      %28 = arith.subf %26, %27 : vector<1x128xf32>
      %cst_18 = arith.constant 0.000000e+00 : f32
      %29 = vector.broadcast %cst_18 : f32 to vector<1x128xf32>
      %30 = arith.maximumf %28, %29 : vector<1x128xf32>
      %cst_19 = arith.constant 9.99999974E-6 : f32
      %31 = vector.broadcast %cst_19 : f32 to vector<1x128xf32>
      %32 = arith.addf %30, %31 : vector<1x128xf32>
      %33 = math.rsqrt %32 : vector<1x128xf32>
      %34 = arith.mulf %16, %33 : vector<1x128xf32>
      %35 = arith.mulf %24, %34 : vector<1x128xf32>
      %36 = arith.subf %17, %35 : vector<1x128xf32>
      %37 = vector.broadcast %34 : vector<1x128xf32> to vector<8x128xf32>
      %38 = arith.mulf %15, %37 : vector<8x128xf32>
      %39 = vector.broadcast %36 : vector<1x128xf32> to vector<8x128xf32>
      %40 = arith.addf %38, %39 : vector<8x128xf32>
      %cst_20 = arith.constant 5.000000e-01 : f32
      %41 = vector.broadcast %cst_20 : f32 to vector<8x128xf32>
      %42 = arith.mulf %41, %40 : vector<8x128xf32>
      %cst_21 = arith.constant 0.707106769 : f32
      %43 = vector.broadcast %cst_21 : f32 to vector<8x128xf32>
      %44 = arith.mulf %40, %43 : vector<8x128xf32>
      %45 = math.erf %44 : vector<8x128xf32>
      %cst_22 = arith.constant 1.000000e+00 : f32
      %46 = vector.broadcast %cst_22 : f32 to vector<8x128xf32>
      %47 = arith.addf %46, %45 : vector<8x128xf32>
      %48 = arith.mulf %42, %47 : vector<8x128xf32>
      %c0_23 = arith.constant 0 : index
      %c0_24 = arith.constant 0 : index
      %49 = vector.load %arg5[%c0_23, %c0_24] : memref<8x128xf32, #tpu.memory_space<vmem>>, vector<8x128xf32>
      tpu.vector_store %arg5[%c0_23, %c0_24], %48 {strides = array<i32>} : memref<8x128xf32, #tpu.memory_space<vmem>>, vector<8x128xf32>,
    } else {
    }
    return
  }
  func.func @transform_0(%arg0: i32, %arg1: i32) -> (i32, i32) {
    %c0_i32 = arith.constant 0 : i32
    %c0_i32_0 = arith.constant 0 : i32
    %c0_i32_1 = arith.constant 0 : i32
    return %c0_i32, %c0_i32_0 : i32, i32
  }
  func.func @transform_1(%arg0: i32, %arg1: i32) -> (i32, i32) {
    %c0_i32 = arith.constant 0 : i32
    return %arg1, %arg0 : i32, i32
  }
  func.func @transform_2(%arg0: i32, %arg1: i32) -> (i32, i32) {
    %c0_i32 = arith.constant 0 : i32
    %c0_i32_0 = arith.constant 0 : i32
    return %c0_i32, %arg0 : i32, i32
  }
  func.func @transform_3(%arg0: i32, %arg1: i32) -> (i32, i32) {
    %c0_i32 = arith.constant 0 : i32
    %c0_i32_0 = arith.constant 0 : i32
    return %c0_i32, %arg0 : i32, i32
  }
}

</mosaic_0001>

<bundles_post_ra>
// kernel: _resblock_impl.3
= control target key start
LH: loop header
LB: loop body
LE: loop exit
PB: predicated region body
PF: predicated region fallthrough
CT: control target
= control target key end

     0   :  { %v287_v3 = vmov 0.0|0.0   ;;  %vm288_vm0 = vmmov 0   ;;  %v289_v6 = vmov 0.0   ;;  %s388_s0 = inlined_call_operand.vmem [shape: f32[8,128], index: 0, kind: input, shape index: {}]   ;;  %s389_s1 = inlined_call_operand.vmem [shape: f32[8,128], index: 1, kind: input, shape index: {}]   ;;  %s390_s2 = inlined_call_operand.vmem [shape: f32[128,128], index: 2, kind: input, shape index: {}]   ;;  %s391_s3 = inlined_call_operand.vmem [shape: f32[8,128], index: 3, kind: input, shape index: {}]   ;;  %s392_s4 = inlined_call_operand.hbm [shape: f32[8,128], index: 4, kind: output, shape index: {}]  }
   0x1   :  { %v29_v0 = vld [vmem:[%s390_s2] sm:$0xff]  ;;  %v30_v1 = vld [vmem:[%s390_s2 + $0x8] sm:$0xff]  ;;  %v31_v2 = vld [vmem:[%s390_s2 + $0x10] sm:$0xff]  ;;  %231 = vmatprep.subr.bf16.mxu0 %v287_v3  ;;  %228 = vmatprep.mubr.msk.f32.mxu0 %vm288_vm0, %v289_v6 }
   0x2   :  { %v232_v4 = vpack.c.bf16 %v30_v1, %v29_v0  ;;  %v32_v5 = vld [vmem:[%s390_s2 + $0x18] sm:$0xff]  ;;  %v33_v8 = vld [vmem:[%s390_s2 + $0x20] sm:$0xff]  ;;  %v34_v9 = vld [vmem:[%s390_s2 + $0x28] sm:$0xff] }
   0x3   :  { %v235_v7 = vpack.c.bf16 %v32_v5, %v31_v2 }
   0x4   :  { %233 = vmatpush3.bf16.msra.mxu0 %v232_v4 }
   0x5   :  { %234 = vmatprep.subr.bf16.mxu0 %v287_v3 }
   0x6   :  { %9 = vsyncpa [#allocation3], 0  ;;  %v238_v10 = vpack.c.bf16 %v34_v9, %v33_v8  ;;  %v35_v11 = vld [vmem:[%s390_s2 + $0x30] sm:$0xff]  ;;  %v36_v12 = vld [vmem:[%s390_s2 + $0x38] sm:$0xff]  ;;  %v147_v48 = vlaneseq  ;;  %s290_s27 = smov [#allocation2]  }
   0x7   :  { %v241_v13 = vpack.c.bf16 %v36_v12, %v35_v11  ;;  %v37_v14 = vld [vmem:[%s390_s2 + $0x40] sm:$0xff]  ;;  %v38_v15 = vld [vmem:[%s390_s2 + $0x48] sm:$0xff]  ;;  %v39_v17 = vld [vmem:[%s390_s2 + $0x50] sm:$0xff]  ;;  %s170_s28 = sshll.u32 %s290_s27, 4  ;;  %s171_s28 = int_to_ptr.vmem [resolvable:$true] %s170_s28 }
   0x8   :  { %236 = vmatpush3.bf16.msra.mxu0 %v235_v7  ;;  %v244_v16 = vpack.c.bf16 %v38_v15, %v37_v14  ;;  %v40_v18 = vld [vmem:[%s390_s2 + $0x58] sm:$0xff]  ;;  %v41_v20 = vld [vmem:[%s390_s2 + $0x60] sm:$0xff]  ;;  %v42_v21 = vld [vmem:[%s390_s2 + $0x68] sm:$0xff]  ;;  %v148_v49 = vshrl.u32 %v147_v48, 7  ;;  %p268_p1 = scmp.lt.s32.totalorder %s171_s28, %s171_s28 }
   0x9   :  { %237 = vmatprep.subr.bf16.mxu0 %v287_v3  ;;  %v247_v19 = vpack.c.bf16 %v40_v18, %v39_v17  ;;  %v250_v22 = vpack.c.bf16 %v42_v21, %v41_v20  ;;  %v43_v23 = vld [vmem:[%s390_s2 + $0x70] sm:$0xff]  ;;  %v44_v24 = vld [vmem:[%s390_s2 + $0x78] sm:$0xff]  ;;  %v27_v26 = vld [vmem:[%s388_s0] sm:$0xff] }
   0xa   :  { %v253_v25 = vpack.c.bf16 %v44_v24, %v43_v23  ;;  %v122_v50 = vld [vmem:[%s391_s3 + $0x2] sm:$0x1]  ;;  %v149_v51 = vsub.s32 0, %v148_v49  ;;  %v123_v54 = vld [vmem:[%s391_s3 + $0x3] sm:$0x1]  ;;  %s263_s3 = scalar_lea.vmem %s171_s28, 128 }
   0xb   :  { %v120_v60 = vld [vmem:[%s389_s1] sm:$0xff]  ;;  %p264_p0 = scmp.ne.s32.totalorder %s171_s28, %s263_s3  ;;  %p269_p2 = scmp.lt.s32.totalorder %s263_s3, %s263_s3 }
   0xc   :  { %239 = vmatpush3.bf16.msra.mxu0 %v238_v10 }
   0xd   :  { %240 = vmatprep.subr.bf16.mxu0 %v287_v3  ;;  %p270_p3 = por %p269_p2, %p268_p1 }
   0xf   :  { %p271_p4 = pnand %p270_p3, %p264_p0 }
  0x10   :  { %242 = vmatpush3.bf16.msra.mxu0 %v241_v13 }
  0x11   :  { %243 = vmatprep.subr.bf16.mxu0 %v287_v3 }
  0x14   :  { %245 = vmatpush3.bf16.msra.mxu0 %v244_v16 }
  0x15   :  { %246 = vmatprep.subr.bf16.mxu0 %v287_v3 }
  0x18   :  { %248 = vmatpush3.bf16.msra.mxu0 %v247_v19 }
  0x19   :  { %249 = vmatprep.subr.bf16.mxu0 %v287_v3 }
  0x1c   :  { %251 = vmatpush3.bf16.msra.mxu0 %v250_v22 }
  0x1d   :  { %252 = vmatprep.subr.bf16.mxu0 %v287_v3 }
  0x20   :  { %254 = vmatpush3.bf16.msra.mxu0 %v253_v25 }
  0x23   :  { %229 = vmatmul.mubr.f32.vlgmr.msra.gmra.mrb[0].mxu0 %v27_v26 }
  0xf6   :  { %v111_v27 = vpop.f32.mrb[0].mxu0 }
  0xf7   :  { %v230_v28 = vpop.f32.mrb[1].mxu0  ;;  %v124_v29 = vrot.slane %v111_v27, 4  ;;  %v130_v30 = vmul.f32 %v111_v27, %v111_v27 }
  0xf9   :  { %v125_v31 = vadd.f32 %v124_v29, %v111_v27  ;;  %v131_v32 = vrot.slane %v130_v30, 4 }
  0xfb   :  { %v126_v33 = vrot.slane %v125_v31, 2  ;;  %v132_v34 = vadd.f32 %v131_v32, %v130_v30 }
  0xfd   :  { %v127_v35 = vadd.f32 %v126_v33, %v125_v31  ;;  %v133_v36 = vrot.slane %v132_v34, 2 }
  0xff   :  { %v128_v37 = vrot.slane %v127_v35, 1  ;;  %v134_v38 = vadd.f32 %v133_v36, %v132_v34 }
 0x101   :  { %v129_v39 = vadd.f32 %v128_v37, %v127_v35  ;;  %v135_v40 = vrot.slane %v134_v38, 1 }
 0x103   :  { %v136_v41 = vadd.f32 %v135_v40, %v134_v38  ;;  %v137_v42 = vmul.f32 0.125, %v129_v39 }
 0x105   :  { %v138_v43 = vmul.f32 0.125, %v136_v41  ;;  %v139_v44 = vmul.f32 %v137_v42, %v137_v42 }
 0x107   :  { %v140_v45 = vsub.f32 %v138_v43, %v139_v44 }
 0x109   :  { %v141_v46 = vmax.f32 %v140_v45, 0.0 }
 0x10b   :  { %v142_v47 = vadd.f32 1e-05, %v141_v46 }
 0x10d   :  { %259 = vrsqrt.f32 %v142_v47 }
 0x117   :  { %v260_v52 = vpop.eup %259 }
 0x118   :  { %v144_v53 = vmul.f32 %v260_v52, %v122_v50 }
 0x11a   :  { %v145_v55 = vmul.f32 %v144_v53, %v137_v42  ;;  %v150_v56 = vrot.slane %v144_v53, %v149_v51 }
 0x11c   :  { %v146_v57 = vsub.f32 %v123_v54, %v145_v55  ;;  %v151_v58 = vmul.f32 %v150_v56, %v111_v27 }
 0x11e   :  { %v155_v59 = vrot.slane %v146_v57, %v149_v51 }
 0x120   :  { %v156_v61 = vadd.f32 %v155_v59, %v151_v58 }
 0x122   :  { %v157_v62 = vadd.f32 %v156_v61, %v120_v60 }
 0x124   :  { %v159_v63 = vmul.f32 0.70710677, %v157_v62  ;;  %v158_v1 = vmul.f32 0.5, %v157_v62 }
 0x126   :  { %261 = verf.f32 %v159_v63 }
 0x130   :  { %v262_v0 = vpop.eup %261 }
 0x131   :  { %v161_v2 = vadd.f32 1.0, %v262_v0 }
 0x133   :  { %v162_v3 = vmul.f32 %v161_v2, %v158_v1 }
 0x135   :  { %163 = vst [vmem:[#allocation2] sm:$0xff] %v162_v3 }
 0x136   :  { %274 = shalt.err (!%p271_p4)
}
 0x137   :  { %s275_s30 = scalar_lea.hbm %s392_s4, 128 }
 0x138   :  { %p276_p5 = scmp.ne.s32.totalorder %s392_s4, %s275_s30  ;;  %p279_p6 = scmp.lt.u32.totalorder %s275_s30, %s392_s4 }
 0x13a   :  { %p281_p7 = pnand %p279_p6, %p276_p5 }
 0x13c   :  { %284 = shalt.err (!%p281_p7)
}
 0x13d   :  { %173 = dma.vmem_to_hbm [thread:$0]  %s171_s28, 128, %s392_s4, [#allocation3]  }
 0x13e   :  { %285 = dma.done.wait [#allocation3], 128  }
 0x13f   :  { %286 = vsyncadd [#allocation3], 4294967168 }
 0x140   :  { %177 = vsyncpa [#allocation3], 1 }

// kernel: _resblock_impl.2
= control target key start
LH: loop header
LB: loop body
LE: loop exit
PB: predicated region body
PF: predicated region fallthrough
CT: control target
= control target key end

     0   :  { %8 = vsyncpa [#allocation3], 0  ;;  %s288_s12 = smov [#allocation2]   ;;  %s338_s0 = inlined_call_operand.vmem [shape: f32[8,128], index: 0, kind: input, shape index: {}]   ;;  %s339_s1 = inlined_call_operand.hbm [shape: f32[128,128], index: 1, kind: input, shape index: {}]   ;;  %s340_s2 = inlined_call_operand.vmem [shape: f32[8,128], index: 2, kind: input, shape index: {}]   ;;  %s341_s3 = inlined_call_operand.vmem [shape: f32[8,128], index: 3, kind: output, shape index: {}]  }
   0x1   :  { %s16_s13 = sshll.u32 %s288_s12, 4  ;;  %s264_s16 = scalar_lea.hbm %s339_s1, 2048  ;;  %s17_s13 = int_to_ptr.vmem [resolvable:$true] %s16_s13 }
   0x2   :  { %p265_p0 = scmp.ne.s32.totalorder %s339_s1, %s264_s16  ;;  %p268_p1 = scmp.lt.u32.totalorder %s264_s16, %s339_s1 }
   0x4   :  { %p270_p2 = pnand %p268_p1, %p265_p0 }
   0x6   :  { %273 = shalt.err (!%p270_p2)
}
   0x7   :  { %s274_s21 = scalar_lea.vmem %s17_s13, 2048  ;;  %p279_p4 = scmp.lt.s32.totalorder %s17_s13, %s17_s13 }
   0x8   :  { %p275_p3 = scmp.ne.s32.totalorder %s17_s13, %s274_s21  ;;  %p280_p5 = scmp.lt.s32.totalorder %s274_s21, %s274_s21 }
   0xa   :  { %p281_p6 = por %p280_p5, %p279_p4 }
   0xc   :  { %p282_p7 = pnand %p281_p6, %p275_p3 }
   0xe   :  { %285 = shalt.err (!%p282_p7)
}
   0xf   :  { %s289_s22 = smov 128   ;;  %s290_s23 = smov 8  }
  0x10   :  { %22 = dma.hbm_to_vmem [thread:$0]  %s339_s1, 2048, %s17_s13, [#allocation3], %s289_s22, %s289_s22, %s290_s23  }
  0x11   :  { %286 = dma.done.wait [#allocation3], 2048  }
  0x12   :  { %287 = vsyncadd [#allocation3], 4294965248  ;;  %v291_v0 = vmov 0.0|0.0   ;;  %vm292_vm0 = vmmov 0   ;;  %v293_v1 = vmov 0.0   ;;  %v39_v2 = vld [vmem:[#allocation2] sm:$0xff]  ;;  %v156_v48 = vlaneseq }
  0x13   :  { %230 = vmatprep.subr.bf16.mxu0 %v291_v0  ;;  %227 = vmatprep.mubr.msk.f32.mxu0 %vm292_vm0, %v293_v1  ;;  %v40_v3 = vld [vmem:[#allocation2 + $0x8] sm:$0xff]  ;;  %v41_v4 = vld [vmem:[#allocation2 + $0x10] sm:$0xff]  ;;  %v42_v6 = vld [vmem:[#allocation2 + $0x18] sm:$0xff] }
  0x14   :  { %v231_v5 = vpack.c.bf16 %v40_v3, %v39_v2  ;;  %v234_v7 = vpack.c.bf16 %v42_v6, %v41_v4  ;;  %v43_v8 = vld [vmem:[#allocation2 + $0x20] sm:$0xff]  ;;  %v44_v9 = vld [vmem:[#allocation2 + $0x28] sm:$0xff]  ;;  %v45_v11 = vld [vmem:[#allocation2 + $0x30] sm:$0xff]  ;;  %v157_v49 = vshrl.u32 %v156_v48, 7 }
  0x15   :  { %v237_v10 = vpack.c.bf16 %v44_v9, %v43_v8  ;;  %v46_v12 = vld [vmem:[#allocation2 + $0x38] sm:$0xff]  ;;  %v47_v14 = vld [vmem:[#allocation2 + $0x40] sm:$0xff]  ;;  %v48_v15 = vld [vmem:[#allocation2 + $0x48] sm:$0xff] }
  0x16   :  { %232 = vmatpush3.bf16.msra.mxu0 %v231_v5  ;;  %v240_v13 = vpack.c.bf16 %v46_v12, %v45_v11  ;;  %v243_v16 = vpack.c.bf16 %v48_v15, %v47_v14  ;;  %v49_v17 = vld [vmem:[#allocation2 + $0x50] sm:$0xff]  ;;  %v50_v18 = vld [vmem:[#allocation2 + $0x58] sm:$0xff]  ;;  %v51_v20 = vld [vmem:[#allocation2 + $0x60] sm:$0xff]  ;;  %v158_v51 = vsub.s32 0, %v157_v49 }
  0x17   :  { %233 = vmatprep.subr.bf16.mxu0 %v291_v0  ;;  %v246_v19 = vpack.c.bf16 %v50_v18, %v49_v17  ;;  %v52_v21 = vld [vmem:[#allocation2 + $0x68] sm:$0xff]  ;;  %v53_v23 = vld [vmem:[#allocation2 + $0x70] sm:$0xff]  ;;  %v54_v24 = vld [vmem:[#allocation2 + $0x78] sm:$0xff] }
  0x18   :  { %v249_v22 = vpack.c.bf16 %v52_v21, %v51_v20  ;;  %v252_v25 = vpack.c.bf16 %v54_v24, %v53_v23  ;;  %v37_v26 = vld [vmem:[%s338_s0] sm:$0xff] }
  0x19   :  { %v131_v50 = vld [vmem:[%s340_s2] sm:$0x1]  ;;  %v132_v54 = vld [vmem:[%s340_s2 + $0x1] sm:$0x1] }
  0x1a   :  { %235 = vmatpush3.bf16.msra.mxu0 %v234_v7 }
  0x1b   :  { %236 = vmatprep.subr.bf16.mxu0 %v291_v0 }
  0x1e   :  { %238 = vmatpush3.bf16.msra.mxu0 %v237_v10 }
  0x1f   :  { %239 = vmatprep.subr.bf16.mxu0 %v291_v0 }
  0x22   :  { %241 = vmatpush3.bf16.msra.mxu0 %v240_v13 }
  0x23   :  { %242 = vmatprep.subr.bf16.mxu0 %v291_v0 }
  0x26   :  { %244 = vmatpush3.bf16.msra.mxu0 %v243_v16 }
  0x27   :  { %245 = vmatprep.subr.bf16.mxu0 %v291_v0 }
  0x2a   :  { %247 = vmatpush3.bf16.msra.mxu0 %v246_v19 }
  0x2b   :  { %248 = vmatprep.subr.bf16.mxu0 %v291_v0 }
  0x2e   :  { %250 = vmatpush3.bf16.msra.mxu0 %v249_v22 }
  0x2f   :  { %251 = vmatprep.subr.bf16.mxu0 %v291_v0 }
  0x32   :  { %253 = vmatpush3.bf16.msra.mxu0 %v252_v25 }
  0x35   :  { %228 = vmatmul.mubr.f32.vlgmr.msra.gmra.mrb[0].mxu0 %v37_v26 }
 0x108   :  { %v121_v27 = vpop.f32.mrb[0].mxu0 }
 0x109   :  { %v229_v28 = vpop.f32.mrb[1].mxu0  ;;  %v133_v29 = vrot.slane %v121_v27, 4  ;;  %v139_v30 = vmul.f32 %v121_v27, %v121_v27 }
 0x10b   :  { %v134_v31 = vadd.f32 %v133_v29, %v121_v27  ;;  %v140_v32 = vrot.slane %v139_v30, 4 }
 0x10d   :  { %v135_v33 = vrot.slane %v134_v31, 2  ;;  %v141_v34 = vadd.f32 %v140_v32, %v139_v30 }
 0x10f   :  { %v136_v35 = vadd.f32 %v135_v33, %v134_v31  ;;  %v142_v36 = vrot.slane %v141_v34, 2 }
 0x111   :  { %v137_v37 = vrot.slane %v136_v35, 1  ;;  %v143_v38 = vadd.f32 %v142_v36, %v141_v34 }
 0x113   :  { %v138_v39 = vadd.f32 %v137_v37, %v136_v35  ;;  %v144_v40 = vrot.slane %v143_v38, 1 }
 0x115   :  { %v145_v41 = vadd.f32 %v144_v40, %v143_v38  ;;  %v146_v42 = vmul.f32 0.125, %v138_v39 }
 0x117   :  { %v147_v43 = vmul.f32 0.125, %v145_v41  ;;  %v148_v44 = vmul.f32 %v146_v42, %v146_v42 }
 0x119   :  { %v149_v45 = vsub.f32 %v147_v43, %v148_v44 }
 0x11b   :  { %v150_v46 = vmax.f32 %v149_v45, 0.0 }
 0x11d   :  { %v151_v47 = vadd.f32 1e-05, %v150_v46 }
 0x11f   :  { %260 = vrsqrt.f32 %v151_v47 }
 0x129   :  { %v261_v52 = vpop.eup %260 }
 0x12a   :  { %v153_v53 = vmul.f32 %v261_v52, %v131_v50 }
 0x12c   :  { %v154_v55 = vmul.f32 %v153_v53, %v146_v42  ;;  %v159_v56 = vrot.slane %v153_v53, %v158_v51 }
 0x12e   :  { %v155_v57 = vsub.f32 %v132_v54, %v154_v55  ;;  %v160_v58 = vmul.f32 %v159_v56, %v121_v27 }
 0x130   :  { %v164_v59 = vrot.slane %v155_v57, %v158_v51 }
 0x132   :  { %v165_v60 = vadd.f32 %v164_v59, %v160_v58 }
 0x134   :  { %v167_v61 = vmul.f32 0.70710677, %v165_v60  ;;  %v166_v63 = vmul.f32 0.5, %v165_v60 }
 0x136   :  { %262 = verf.f32 %v167_v61 }
 0x140   :  { %v263_v62 = vpop.eup %262 }
 0x141   :  { %v169_v0 = vadd.f32 1.0, %v263_v62 }
 0x143   :  { %v170_v1 = vmul.f32 %v169_v0, %v166_v63 }
 0x145   :  { %171 = vst [vmem:[%s341_s3] sm:$0xff] %v170_v1 }
 0x146   :  { %176 = vsyncpa [#allocation3], 1 }

// kernel: _resblock_impl.3
= control target key start
LH: loop header
LB: loop body
LE: loop exit
PB: predicated region body
PF: predicated region fallthrough
CT: control target
= control target key end

     0   :  { %v287_v3 = vmov 0.0|0.0   ;;  %vm288_vm0 = vmmov 0   ;;  %v289_v6 = vmov 0.0   ;;  %s388_s0 = inlined_call_operand.vmem [shape: f32[8,128], index: 0, kind: input, shape index: {}]   ;;  %s389_s1 = inlined_call_operand.vmem [shape: f32[8,128], index: 1, kind: input, shape index: {}]   ;;  %s390_s2 = inlined_call_operand.vmem [shape: f32[128,128], index: 2, kind: input, shape index: {}]   ;;  %s391_s3 = inlined_call_operand.vmem [shape: f32[8,128], index: 3, kind: input, shape index: {}]   ;;  %s392_s4 = inlined_call_operand.hbm [shape: f32[8,128], index: 4, kind: output, shape index: {}]  }
   0x1   :  { %v29_v0 = vld [vmem:[%s390_s2] sm:$0xff]  ;;  %v30_v1 = vld [vmem:[%s390_s2 + $0x8] sm:$0xff]  ;;  %v31_v2 = vld [vmem:[%s390_s2 + $0x10] sm:$0xff]  ;;  %231 = vmatprep.subr.bf16.mxu0 %v287_v3  ;;  %228 = vmatprep.mubr.msk.f32.mxu0 %vm288_vm0, %v289_v6 }
   0x2   :  { %v232_v4 = vpack.c.bf16 %v30_v1, %v29_v0  ;;  %v32_v5 = vld [vmem:[%s390_s2 + $0x18] sm:$0xff]  ;;  %v33_v8 = vld [vmem:[%s390_s2 + $0x20] sm:$0xff]  ;;  %v34_v9 = vld [vmem:[%s390_s2 + $0x28] sm:$0xff] }
   0x3   :  { %v235_v7 = vpack.c.bf16 %v32_v5, %v31_v2 }
   0x4   :  { %233 = vmatpush3.bf16.msra.mxu0 %v232_v4 }
   0x5   :  { %234 = vmatprep.subr.bf16.mxu0 %v287_v3 }
   0x6   :  { %9 = vsyncpa [#allocation3], 0  ;;  %v238_v10 = vpack.c.bf16 %v34_v9, %v33_v8  ;;  %v35_v11 = vld [vmem:[%s390_s2 + $0x30] sm:$0xff]  ;;  %v36_v12 = vld [vmem:[%s390_s2 + $0x38] sm:$0xff]  ;;  %v147_v48 = vlaneseq  ;;  %s290_s27 = smov [#allocation2]  }
   0x7   :  { %v241_v13 = vpack.c.bf16 %v36_v12, %v35_v11  ;;  %v37_v14 = vld [vmem:[%s390_s2 + $0x40] sm:$0xff]  ;;  %v38_v15 = vld [vmem:[%s390_s2 + $0x48] sm:$0xff]  ;;  %v39_v17 = vld [vmem:[%s390_s2 + $0x50] sm:$0xff]  ;;  %s170_s28 = sshll.u32 %s290_s27, 4  ;;  %s171_s28 = int_to_ptr.vmem [resolvable:$true] %s170_s28 }
   0x8   :  { %236 = vmatpush3.bf16.msra.mxu0 %v235_v7  ;;  %v244_v16 = vpack.c.bf16 %v38_v15, %v37_v14  ;;  %v40_v18 = vld [vmem:[%s390_s2 + $0x58] sm:$0xff]  ;;  %v41_v20 = vld [vmem:[%s390_s2 + $0x60] sm:$0xff]  ;;  %v42_v21 = vld [vmem:[%s390_s2 + $0x68] sm:$0xff]  ;;  %v148_v49 = vshrl.u32 %v147_v48, 7  ;;  %p268_p1 = scmp.lt.s32.totalorder %s171_s28, %s171_s28 }
   0x9   :  { %237 = vmatprep.subr.bf16.mxu0 %v287_v3  ;;  %v247_v19 = vpack.c.bf16 %v40_v18, %v39_v17  ;;  %v250_v22 = vpack.c.bf16 %v42_v21, %v41_v20  ;;  %v43_v23 = vld [vmem:[%s390_s2 + $0x70] sm:$0xff]  ;;  %v44_v24 = vld [vmem:[%s390_s2 + $0x78] sm:$0xff]  ;;  %v27_v26 = vld [vmem:[%s388_s0] sm:$0xff] }
   0xa   :  { %v253_v25 = vpack.c.bf16 %v44_v24, %v43_v23  ;;  %v122_v50 = vld [vmem:[%s391_s3 + $0x2] sm:$0x1]  ;;  %v149_v51 = vsub.s32 0, %v148_v49  ;;  %v123_v54 = vld [vmem:[%s391_s3 + $0x3] sm:$0x1]  ;;  %s263_s3 = scalar_lea.vmem %s171_s28, 128 }
   0xb   :  { %v120_v60 = vld [vmem:[%s389_s1] sm:$0xff]  ;;  %p264_p0 = scmp.ne.s32.totalorder %s171_s28, %s263_s3  ;;  %p269_p2 = scmp.lt.s32.totalorder %s263_s3, %s263_s3 }
   0xc   :  { %239 = vmatpush3.bf16.msra.mxu0 %v238_v10 }
   0xd   :  { %240 = vmatprep.subr.bf16.mxu0 %v287_v3  ;;  %p270_p3 = por %p269_p2, %p268_p1 }
   0xf   :  { %p271_p4 = pnand %p270_p3, %p264_p0 }
  0x10   :  { %242 = vmatpush3.bf16.msra.mxu0 %v241_v13 }
  0x11   :  { %243 = vmatprep.subr.bf16.mxu0 %v287_v3 }
  0x14   :  { %245 = vmatpush3.bf16.msra.mxu0 %v244_v16 }
  0x15   :  { %246 = vmatprep.subr.bf16.mxu0 %v287_v3 }
  0x18   :  { %248 = vmatpush3.bf16.msra.mxu0 %v247_v19 }
  0x19   :  { %249 = vmatprep.subr.bf16.mxu0 %v287_v3 }
  0x1c   :  { %251 = vmatpush3.bf16.msra.mxu0 %v250_v22 }
  0x1d   :  { %252 = vmatprep.subr.bf16.mxu0 %v287_v3 }
  0x20   :  { %254 = vmatpush3.bf16.msra.mxu0 %v253_v25 }
  0x23   :  { %229 = vmatmul.mubr.f32.vlgmr.msra.gmra.mrb[0].mxu0 %v27_v26 }
  0xf6   :  { %v111_v27 = vpop.f32.mrb[0].mxu0 }
  0xf7   :  { %v230_v28 = vpop.f32.mrb[1].mxu0  ;;  %v124_v29 = vrot.slane %v111_v27, 4  ;;  %v130_v30 = vmul.f32 %v111_v27, %v111_v27 }
  0xf9   :  { %v125_v31 = vadd.f32 %v124_v29, %v111_v27  ;;  %v131_v32 = vrot.slane %v130_v30, 4 }
  0xfb   :  { %v126_v33 = vrot.slane %v125_v31, 2  ;;  %v132_v34 = vadd.f32 %v131_v32, %v130_v30 }
  0xfd   :  { %v127_v35 = vadd.f32 %v126_v33, %v125_v31  ;;  %v133_v36 = vrot.slane %v132_v34, 2 }
  0xff   :  { %v128_v37 = vrot.slane %v127_v35, 1  ;;  %v134_v38 = vadd.f32 %v133_v36, %v132_v34 }
 0x101   :  { %v129_v39 = vadd.f32 %v128_v37, %v127_v35  ;;  %v135_v40 = vrot.slane %v134_v38, 1 }
 0x103   :  { %v136_v41 = vadd.f32 %v135_v40, %v134_v38  ;;  %v137_v42 = vmul.f32 0.125, %v129_v39 }
 0x105   :  { %v138_v43 = vmul.f32 0.125, %v136_v41  ;;  %v139_v44 = vmul.f32 %v137_v42, %v137_v42 }
 0x107   :  { %v140_v45 = vsub.f32 %v138_v43, %v139_v44 }
 0x109   :  { %v141_v46 = vmax.f32 %v140_v45, 0.0 }
 0x10b   :  { %v142_v47 = vadd.f32 1e-05, %v141_v46 }
 0x10d   :  { %259 = vrsqrt.f32 %v142_v47 }
 0x117   :  { %v260_v52 = vpop.eup %259 }
 0x118   :  { %v144_v53 = vmul.f32 %v260_v52, %v122_v50 }
 0x11a   :  { %v145_v55 = vmul.f32 %v144_v53, %v137_v42  ;;  %v150_v56 = vrot.slane %v144_v53, %v149_v51 }
 0x11c   :  { %v146_v57 = vsub.f32 %v123_v54, %v145_v55  ;;  %v151_v58 = vmul.f32 %v150_v56, %v111_v27 }
 0x11e   :  { %v155_v59 = vrot.slane %v146_v57, %v149_v51 }
 0x120   :  { %v156_v61 = vadd.f32 %v155_v59, %v151_v58 }
 0x122   :  { %v157_v62 = vadd.f32 %v156_v61, %v120_v60 }
 0x124   :  { %v159_v63 = vmul.f32 0.70710677, %v157_v62  ;;  %v158_v1 = vmul.f32 0.5, %v157_v62 }
 0x126   :  { %261 = verf.f32 %v159_v63 }
 0x130   :  { %v262_v0 = vpop.eup %261 }
 0x131   :  { %v161_v2 = vadd.f32 1.0, %v262_v0 }
 0x133   :  { %v162_v3 = vmul.f32 %v161_v2, %v158_v1 }
 0x135   :  { %163 = vst [vmem:[#allocation2] sm:$0xff] %v162_v3 }
 0x136   :  { %274 = shalt.err (!%p271_p4)
}
 0x137   :  { %s275_s30 = scalar_lea.hbm %s392_s4, 128 }
 0x138   :  { %p276_p5 = scmp.ne.s32.totalorder %s392_s4, %s275_s30  ;;  %p279_p6 = scmp.lt.u32.totalorder %s275_s30, %s392_s4 }
 0x13a   :  { %p281_p7 = pnand %p279_p6, %p276_p5 }
 0x13c   :  { %284 = shalt.err (!%p281_p7)
}
 0x13d   :  { %173 = dma.vmem_to_hbm [thread:$0]  %s171_s28, 128, %s392_s4, [#allocation3]  }
 0x13e   :  { %285 = dma.done.wait [#allocation3], 128  }
 0x13f   :  { %286 = vsyncadd [#allocation3], 4294967168 }
 0x140   :  { %177 = vsyncpa [#allocation3], 1 }

// kernel: _resblock_impl.2
= control target key start
LH: loop header
LB: loop body
LE: loop exit
PB: predicated region body
PF: predicated region fallthrough
CT: control target
= control target key end

     0   :  { %8 = vsyncpa [#allocation3], 0  ;;  %s288_s12 = smov [#allocation2]   ;;  %s338_s0 = inlined_call_operand.vmem [shape: f32[8,128], index: 0, kind: input, shape index: {}]   ;;  %s339_s1 = inlined_call_operand.hbm [shape: f32[128,128], index: 1, kind: input, shape index: {}]   ;;  %s340_s2 = inlined_call_operand.vmem [shape: f32[8,128], index: 2, kind: input, shape index: {}]   ;;  %s341_s3 = inlined_call_operand.vmem [shape: f32[8,128], index: 3, kind: output, shape index: {}]  }
   0x1   :  { %s16_s13 = sshll.u32 %s288_s12, 4  ;;  %s264_s16 = scalar_lea.hbm %s339_s1, 2048  ;;  %s17_s13 = int_to_ptr.vmem [resolvable:$true] %s16_s13 }
   0x2   :  { %p265_p0 = scmp.ne.s32.totalorder %s339_s1, %s264_s16  ;;  %p268_p1 = scmp.lt.u32.totalorder %s264_s16, %s339_s1 }
   0x4   :  { %p270_p2 = pnand %p268_p1, %p265_p0 }
   0x6   :  { %273 = shalt.err (!%p270_p2)
}
   0x7   :  { %s274_s21 = scalar_lea.vmem %s17_s13, 2048  ;;  %p279_p4 = scmp.lt.s32.totalorder %s17_s13, %s17_s13 }
   0x8   :  { %p275_p3 = scmp.ne.s32.totalorder %s17_s13, %s274_s21  ;;  %p280_p5 = scmp.lt.s32.totalorder %s274_s21, %s274_s21 }
   0xa   :  { %p281_p6 = por %p280_p5, %p279_p4 }
   0xc   :  { %p282_p7 = pnand %p281_p6, %p275_p3 }
   0xe   :  { %285 = shalt.err (!%p282_p7)
}
   0xf   :  { %s289_s22 = smov 128   ;;  %s290_s23 = smov 8  }
  0x10   :  { %22 = dma.hbm_to_vmem [thread:$0]  %s339_s1, 2048, %s17_s13, [#allocation3], %s289_s22, %s289_s22, %s290_s23  }
  0x11   :  { %286 = dma.done.wait [#allocation3], 2048  }
  0x12   :  { %287 = vsyncadd [#allocation3], 4294965248  ;;  %v291_v0 = vmov 0.0|0.0   ;;  %vm292_vm0 = vmmov 0   ;;  %v293_v1 = vmov 0.0   ;;  %v39_v2 = vld [vmem:[#allocation2] sm:$0xff]  ;;  %v156_v48 = vlaneseq }
  0x13   :  { %230 = vmatprep.subr.bf16.mxu0 %v291_v0  ;;  %227 = vmatprep.mubr.msk.f32.mxu0 %vm292_vm0, %v293_v1  ;;  %v40_v3 = vld [vmem:[#allocation2 + $0x8] sm:$0xff]  ;;  %v41_v4 = vld [vmem:[#allocation2 + $0x10] sm:$0xff]  ;;  %v42_v6 = vld [vmem:[#allocation2 + $0x18] sm:$0xff] }
  0x14   :  { %v231_v5 = vpack.c.bf16 %v40_v3, %v39_v2  ;;  %v234_v7 = vpack.c.bf16 %v42_v6, %v41_v4  ;;  %v43_v8 = vld [vmem:[#allocation2 + $0x20] sm:$0xff]  ;;  %v44_v9 = vld [vmem:[#allocation2 + $0x28] sm:$0xff]  ;;  %v45_v11 = vld [vmem:[#allocation2 + $0x30] sm:$0xff]  ;;  %v157_v49 = vshrl.u32 %v156_v48, 7 }
  0x15   :  { %v237_v10 = vpack.c.bf16 %v44_v9, %v43_v8  ;;  %v46_v12 = vld [vmem:[#allocation2 + $0x38] sm:$0xff]  ;;  %v47_v14 = vld [vmem:[#allocation2 + $0x40] sm:$0xff]  ;;  %v48_v15 = vld [vmem:[#allocation2 + $0x48] sm:$0xff] }
  0x16   :  { %232 = vmatpush3.bf16.msra.mxu0 %v231_v5  ;;  %v240_v13 = vpack.c.bf16 %v46_v12, %v45_v11  ;;  %v243_v16 = vpack.c.bf16 %v48_v15, %v47_v14  ;;  %v49_v17 = vld [vmem:[#allocation2 + $0x50] sm:$0xff]  ;;  %v50_v18 = vld [vmem:[#allocation2 + $0x58] sm:$0xff]  ;;  %v51_v20 = vld [vmem:[#allocation2 + $0x60] sm:$0xff]  ;;  %v158_v51 = vsub.s32 0, %v157_v49 }
  0x17   :  { %233 = vmatprep.subr.bf16.mxu0 %v291_v0  ;;  %v246_v19 = vpack.c.bf16 %v50_v18, %v49_v17  ;;  %v52_v21 = vld [vmem:[#allocation2 + $0x68] sm:$0xff]  ;;  %v53_v23 = vld [vmem:[#allocation2 + $0x70] sm:$0xff]  ;;  %v54_v24 = vld [vmem:[#allocation2 + $0x78] sm:$0xff] }
  0x18   :  { %v249_v22 = vpack.c.bf16 %v52_v21, %v51_v20  ;;  %v252_v25 = vpack.c.bf16 %v54_v24, %v53_v23  ;;  %v37_v26 = vld [vmem:[%s338_s0] sm:$0xff] }
  0x19   :  { %v131_v50 = vld [vmem:[%s340_s2] sm:$0x1]  ;;  %v132_v54 = vld [vmem:[%s340_s2 + $0x1] sm:$0x1] }
  0x1a   :  { %235 = vmatpush3.bf16.msra.mxu0 %v234_v7 }
  0x1b   :  { %236 = vmatprep.subr.bf16.mxu0 %v291_v0 }
  0x1e   :  { %238 = vmatpush3.bf16.msra.mxu0 %v237_v10 }
  0x1f   :  { %239 = vmatprep.subr.bf16.mxu0 %v291_v0 }
  0x22   :  { %241 = vmatpush3.bf16.msra.mxu0 %v240_v13 }
  0x23   :  { %242 = vmatprep.subr.bf16.mxu0 %v291_v0 }
  0x26   :  { %244 = vmatpush3.bf16.msra.mxu0 %v243_v16 }
  0x27   :  { %245 = vmatprep.subr.bf16.mxu0 %v291_v0 }
  0x2a   :  { %247 = vmatpush3.bf16.msra.mxu0 %v246_v19 }
  0x2b   :  { %248 = vmatprep.subr.bf16.mxu0 %v291_v0 }
  0x2e   :  { %250 = vmatpush3.bf16.msra.mxu0 %v249_v22 }
  0x2f   :  { %251 = vmatprep.subr.bf16.mxu0 %v291_v0 }
  0x32   :  { %253 = vmatpush3.bf16.msra.mxu0 %v252_v25 }
  0x35   :  { %228 = vmatmul.mubr.f32.vlgmr.msra.gmra.mrb[0].mxu0 %v37_v26 }
 0x108   :  { %v121_v27 = vpop.f32.mrb[0].mxu0 }
 0x109   :  { %v229_v28 = vpop.f32.mrb[1].mxu0  ;;  %v133_v29 = vrot.slane %v121_v27, 4  ;;  %v139_v30 = vmul.f32 %v121_v27, %v121_v27 }
 0x10b   :  { %v134_v31 = vadd.f32 %v133_v29, %v121_v27  ;;  %v140_v32 = vrot.slane %v139_v30, 4 }
 0x10d   :  { %v135_v33 = vrot.slane %v134_v31, 2  ;;  %v141_v34 = vadd.f32 %v140_v32, %v139_v30 }
 0x10f   :  { %v136_v35 = vadd.f32 %v135_v33, %v134_v31  ;;  %v142_v36 = vrot.slane %v141_v34, 2 }
 0x111   :  { %v137_v37 = vrot.slane %v136_v35, 1  ;;  %v143_v38 = vadd.f32 %v142_v36, %v141_v34 }
 0x113   :  { %v138_v39 = vadd.f32 %v137_v37, %v136_v35  ;;  %v144_v40 = vrot.slane %v143_v38, 1 }
 0x115   :  { %v145_v41 = vadd.f32 %v144_v40, %v143_v38  ;;  %v146_v42 = vmul.f32 0.125, %v138_v39 }
 0x117   :  { %v147_v43 = vmul.f32 0.125, %v145_v41  ;;  %v148_v44 = vmul.f32 %v146_v42, %v146_v42 }
 0x119   :  { %v149_v45 = vsub.f32 %v147_v43, %v148_v44 }
 0x11b   :  { %v150_v46 = vmax.f32 %v149_v45, 0.0 }
 0x11d   :  { %v151_v47 = vadd.f32 1e-05, %v150_v46 }
 0x11f   :  { %260 = vrsqrt.f32 %v151_v47 }
 0x129   :  { %v261_v52 = vpop.eup %260 }
 0x12a   :  { %v153_v53 = vmul.f32 %v261_v52, %v131_v50 }
 0x12c   :  { %v154_v55 = vmul.f32 %v153_v53, %v146_v42  ;;  %v159_v56 = vrot.slane %v153_v53, %v158_v51 }
 0x12e   :  { %v155_v57 = vsub.f32 %v132_v54, %v154_v55  ;;  %v160_v58 = vmul.f32 %v159_v56, %v121_v27 }
 0x130   :  { %v164_v59 = vrot.slane %v155_v57, %v158_v51 }
 0x132   :  { %v165_v60 = vadd.f32 %v164_v59, %v160_v58 }
 0x134   :  { %v167_v61 = vmul.f32 0.70710677, %v165_v60  ;;  %v166_v63 = vmul.f32 0.5, %v165_v60 }
 0x136   :  { %262 = verf.f32 %v167_v61 }
 0x140   :  { %v263_v62 = vpop.eup %262 }
 0x141   :  { %v169_v0 = vadd.f32 1.0, %v263_v62 }
 0x143   :  { %v170_v1 = vmul.f32 %v169_v0, %v166_v63 }
 0x145   :  { %171 = vst [vmem:[%s341_s3] sm:$0xff] %v170_v1 }
 0x146   :  { %176 = vsyncpa [#allocation3], 1 }

</bundles_post_ra>
